<compile_context>
chip_gen: v7x
topology: tpu7x:2x2x1
jax: 0.10.0
libtpu: 0.0.40
codegen_flags: <defaults>
</compile_context>

<pallas_src>
import jax
import jax.numpy as jnp
from jax.experimental import pallas as pl
from jax.experimental.pallas import tpu as pltpu


def _round_up(x: int, m: int) -> int:
    return -(-x // m) * m


def _embed_kernel(patches_ref, w_ref, pos_ref, o_ref):
    # patches_ref: (1, tn, Kp) bf16 -- one (batch, patch-row-tile) of im2col'd pixels
    # w_ref:       (Kp, D)     bf16 -- conv weight as a dense matrix (constant block)
    # pos_ref:     (Np, D)     bf16 -- FULL position table (+conv bias), resident
    # o_ref:       (1, tn, D)       -- output tile (bf16 by default)
    tn = o_ref.shape[1]
    start = pl.multiple_of(pl.program_id(1) * tn, tn)
    pos = pos_ref[pl.ds(start, tn), :].astype(jnp.float32)            # (tn, D)
    acc = jnp.dot(patches_ref[0], w_ref[...],
                  preferred_element_type=jnp.float32)                 # (tn, D) f32
    o_ref[0] = (acc + pos).astype(o_ref.dtype)


def siglip_vision_embeddings(pixel_values, conv_w, conv_b, pos_emb, patch_size,
                             *, tile_n=None, out_dtype=jnp.bfloat16,
                             vmem_budget_bytes=40 * 1024 * 1024):
    """SiglipVisionEmbeddings forward.

    pixel_values: (B, C, H, W) NCHW
    conv_w:       (D, C, P, P)   conv_b: (D,)   pos_emb: (N, D)
    returns (B, N, D) in `out_dtype`, with N = (H//P) * (W//P).
    """
    B, C, H, W = pixel_values.shape
    D = conv_w.shape[0]
    P = patch_size
    Hp, Wp = H // P, W // P
    N = Hp * Wp
    K = C * P * P
    out_itemsize = jnp.dtype(out_dtype).itemsize

    # Contraction dim padded to the MXU lane multiple (128). Kept at 128 (not
    # 256) while im2col is materialized in HBM — see header note.
    Kp = _round_up(K, 128)

    def _vmem_estimate(tn_, np_):
        # Conservative double-buffered working set (bytes), incl. f32 temporaries.
        return (2 * tn_ * Kp * 2                 # patches tile, bf16
                + 2 * tn_ * D * out_itemsize     # output tile
                + 2 * Kp * D * 2                 # weight (constant block)
                + 2 * np_ * D * 2                # resident pos table, bf16
                + 2 * tn_ * D * 4)               # f32 accumulator / add temporaries

    # ---- tile selection on the patch axis N ---------------------------------
    if tile_n is not None:
        tn = max(16, _round_up(min(tile_n, N), 16))       # bf16 packs 16 rows/sublane pair
        n_tiles = -(-N // tn)
    else:
        # Collapse N into a single tile when it fits the VMEM budget (fewer
        # grid steps, bigger DMAs).  At B == 1 keep >= 2 parallel grid units so
        # both of v7x's TensorCores get work (v5e/v6e unaffected).
        n_tiles = 1 if B >= 2 else 2
        tn = max(16, _round_up(-(-N // n_tiles), 16))
        while _vmem_estimate(tn, tn * n_tiles) > vmem_budget_bytes and tn > 16:
            n_tiles += 1
            tn = max(16, _round_up(-(-N // n_tiles), 16))
    Np = tn * n_tiles

    # ---- glue (plain JAX): im2col.  Flatten order (c, ph, pw) matches the
    # conv-weight flatten order below, so the matmul reproduces the conv.
    # TODO(synk): fuse im2col into the kernel (read raw image tiles and reorder
    # in VMEM) to drop the materialized HBM round trip of `patches`; kept in
    # the wrapper for now to avoid risky multi-axis in-kernel transposes.
    patches = pixel_values.reshape(B, C, Hp, P, Wp, P)
    patches = patches.transpose(0, 2, 4, 1, 3, 5).reshape(B, N, K)
    patches = patches.astype(jnp.bfloat16)                     # MXU operand dtype
    w_bf = conv_w.reshape(D, K).T.astype(jnp.bfloat16)          # (K, D)

    # Fold conv bias into the position table (fold in f32, store bf16: one
    # operand stream saved and half the pos DMA / VMEM cost).
    pos_plus_b = (pos_emb.astype(jnp.float32)
                  + conv_b.astype(jnp.float32)[None, :]).astype(jnp.bfloat16)

    # Zero-pad K (both operands identically -> exact) and N (extra rows are
    # computed on zeros and sliced off after the call).
    if Kp != K:
        patches = jnp.pad(patches, ((0, 0), (0, 0), (0, Kp - K)))
        w_bf = jnp.pad(w_bf, ((0, Kp - K), (0, 0)))
    if Np != N:
        patches = jnp.pad(patches, ((0, 0), (0, Np - N), (0, 0)))
        pos_plus_b = jnp.pad(pos_plus_b, ((0, Np - N), (0, 0)))

    cost = pl.CostEstimate(
        flops=2 * B * Np * Kp * D,
        transcendentals=0,
        bytes_accessed=(B * Np * Kp * 2            # patches (bf16), read once
                        + Kp * D * 2               # weight (bf16), resident
                        + Np * D * 2               # pos+bias (bf16), resident
                        + B * Np * D * out_itemsize),   # output
    )

    vmem_limit_bytes = int(min(64 * 1024 * 1024,
                               max(32 * 1024 * 1024,
                                   _vmem_estimate(tn, Np) + 4 * 1024 * 1024)))

    out = pl.pallas_call(
        _embed_kernel,
        out_shape=jax.ShapeDtypeStruct((B, Np, D), out_dtype),
        grid_spec=pltpu.PrefetchScalarGridSpec(
            num_scalar_prefetch=0,
            grid=(B, n_tiles),
            in_specs=[
                pl.BlockSpec((1, tn, Kp), lambda b, n: (b, n, 0)),
                # Constant-index weight block: DMA'd once, reused every step.
                # TODO(synk): sweep pipeline_mode=pl.Buffered(1) on the weight
                # and pos blocks to reclaim the second (unused) buffer's VMEM.
                pl.BlockSpec((Kp, D), lambda b, n: (0, 0)),
                # Full pos table resident in VMEM (constant block index): read
                # once per call instead of once per batch element.
                pl.BlockSpec((Np, D), lambda b, n: (0, 0)),
            ],
            out_specs=pl.BlockSpec((1, tn, D), lambda b, n: (b, n, 0)),
        ),
        compiler_params=pltpu.CompilerParams(
            dimension_semantics=("parallel", "parallel"),
            vmem_limit_bytes=vmem_limit_bytes,
        ),
        cost_estimate=cost,
    )(patches, w_bf, pos_plus_b)

    if Np != N:
        out = out[:, :N, :]
    return out


def _reference(pixel_values, conv_w, conv_b, pos_emb, patch_size):
    # Pure-JAX (f32) reference using a real strided convolution (NCHW / OIHW).
    conv = jax.lax.conv_general_dilated(
        pixel_values, conv_w,
        window_strides=(patch_size, patch_size),
        padding="VALID",
        dimension_numbers=("NCHW", "OIHW", "NCHW"),
    ) + conv_b[None, :, None, None]
    B, D, Hp, Wp = conv.shape
    emb = conv.reshape(B, D, Hp * Wp).transpose(0, 2, 1)      # (B, N, D)
    return emb + pos_emb[None]


if __name__ == "__main__":
    # Small config consistent with SiglipVisionConfig:
    # image_size=16, patch_size=4, num_channels=4, hidden_size=32, batch=2
    B, C, IMG, P, HID = 2, 4, 16, 4, 32
    N = (IMG // P) ** 2                                       # num_patches = 16

    key = jax.random.PRNGKey(0)
    k1, k2, k3, k4 = jax.random.split(key, 4)
    pixel_values = jax.random.normal(k1, (B, C, IMG, IMG), jnp.float32)
    conv_w = jax.random.normal(k2, (HID, C, P, P), jnp.float32) * 0.02
    conv_b = jax.random.normal(k3, (HID,), jnp.float32) * 0.02
    pos_emb = jax.random.normal(k4, (N, HID), jnp.float32) * 0.02

    out = siglip_vision_embeddings(pixel_values, conv_w, conv_b, pos_emb, P)
    out = jax.block_until_ready(out)

    ref = _reference(pixel_values, conv_w, conv_b, pos_emb, P)
    assert out.shape == (B, N, HID)
    assert out.dtype == jnp.bfloat16
    # bf16 MXU operands + bf16 output store vs f32 reference -> loose tolerance.
    assert jnp.allclose(out.astype(jnp.float32), ref, atol=2e-2, rtol=2e-2), \
        "mismatch vs reference"
    print("KERNEL_OK")
</pallas_src>

<mosaic_0001>
module attributes {stable_mosaic.version = 11 : i64} {
  func.func @_embed_kernel(%arg0: i32, %arg1: i32, %arg2: memref<1x16x128xbf16, #tpu.memory_space<vmem>>, %arg3: memref<128x32xbf16, #tpu.memory_space<vmem>>, %arg4: memref<16x32xbf16, #tpu.memory_space<vmem>>, %arg5: memref<1x16x32xbf16, #tpu.memory_space<vmem>>) attributes {dimension_semantics = [#tpu.dimension_semantics<parallel>, #tpu.dimension_semantics<parallel>], iteration_bounds = array<i64: 2, 1>, scalar_prefetch = 0 : i64, scratch_operands = 0 : i64, tpu.core_type = #tpu.core_type<tc>, window_params = [{transform_indices = @transform_0, window_bounds = array<i64: 1, 16, 128>}, {pipeline_mode = #tpu.pipeline_mode<synchronous>, transform_indices = @transform_1, window_bounds = array<i64: 128, 32>}, {pipeline_mode = #tpu.pipeline_mode<synchronous>, transform_indices = @transform_2, window_bounds = array<i64: 16, 32>}, {transform_indices = @transform_3, window_bounds = array<i64: 1, 16, 32>}]} {
    %c16_i32 = arith.constant 16 : i32
    %0 = arith.muli %arg1, %c16_i32 : i32
    %1 = tpu.assume_multiple %0, 16 : i32
    %2 = arith.index_cast %1 : i32 to index
    %c0 = arith.constant 0 : index
    %3 = vector.load %arg4[%2, %c0] : memref<16x32xbf16, #tpu.memory_space<vmem>>, vector<16x32xbf16>
    %4 = arith.extf %3 : vector<16x32xbf16> to vector<16x32xf32>
    %c0_0 = arith.constant 0 : index
    %c0_1 = arith.constant 0 : index
    %c0_2 = arith.constant 0 : index
    %5 = vector.load %arg2[%c0_0, %c0_1, %c0_2] : memref<1x16x128xbf16, #tpu.memory_space<vmem>>, vector<1x16x128xbf16>
    %6 = vector.shape_cast %5 : vector<1x16x128xbf16> to vector<16x128xbf16>
    %c0_3 = arith.constant 0 : index
    %c0_4 = arith.constant 0 : index
    %7 = vector.load %arg3[%c0_3, %c0_4] : memref<128x32xbf16, #tpu.memory_space<vmem>>, vector<128x32xbf16>
    %cst = arith.constant dense<0.000000e+00> : vector<16x32xf32>
    %8 = tpu.matmul %6, %7, %cst {dimension_numbers = #tpu.dot_dimension_numbers<[1], [0], [0], [1], [0, 0, 1, 1], [], []>} : vector<16x128xbf16>, vector<128x32xbf16>, vector<16x32xf32> -> vector<16x32xf32>
    %9 = arith.addf %8, %4 : vector<16x32xf32>
    %10 = arith.truncf %9 : vector<16x32xf32> to vector<16x32xbf16>
    %c0_5 = arith.constant 0 : index
    %c0_6 = arith.constant 0 : index
    %c0_7 = arith.constant 0 : index
    %11 = vector.load %arg5[%c0_5, %c0_6, %c0_7] : memref<1x16x32xbf16, #tpu.memory_space<vmem>>, vector<1x16x32xbf16>
    %12 = vector.shape_cast %11 : vector<1x16x32xbf16> to vector<16x32xbf16>
    %13 = vector.shape_cast %10 : vector<16x32xbf16> to vector<1x16x32xbf16>
    tpu.vector_store %arg5[%c0_5, %c0_6, %c0_7], %13 {strides = array<i32>} : memref<1x16x32xbf16, #tpu.memory_space<vmem>>, vector<1x16x32xbf16>,
    return
  }
  func.func @transform_0(%arg0: i32, %arg1: i32) -> (i32, i32, i32) {
    %c0_i32 = arith.constant 0 : i32
    %c0_i32_0 = arith.constant 0 : i32
    return %arg0, %arg1, %c0_i32 : i32, i32, i32
  }
  func.func @transform_1(%arg0: i32, %arg1: i32) -> (i32, i32) {
    %c0_i32 = arith.constant 0 : i32
    %c0_i32_0 = arith.constant 0 : i32
    %c0_i32_1 = arith.constant 0 : i32
    return %c0_i32, %c0_i32_0 : i32, i32
  }
  func.func @transform_2(%arg0: i32, %arg1: i32) -> (i32, i32) {
    %c0_i32 = arith.constant 0 : i32
    %c0_i32_0 = arith.constant 0 : i32
    %c0_i32_1 = arith.constant 0 : i32
    return %c0_i32, %c0_i32_0 : i32, i32
  }
  func.func @transform_3(%arg0: i32, %arg1: i32) -> (i32, i32, i32) {
    %c0_i32 = arith.constant 0 : i32
    %c0_i32_0 = arith.constant 0 : i32
    return %arg0, %arg1, %c0_i32 : i32, i32, i32
  }
}

</mosaic_0001>

<bundles_post_ra>
// kernel: tpu_custom_call.1
= control target key start
LH: loop header
LB: loop body
LE: loop exit
PB: predicated region body
PF: predicated region fallthrough
CT: control target
= control target key end

     0   :  { %8 = vsyncpa [#allocation3], 0  ;;  %s807_s0 = inlined_call_operand.vmem [shape: bf16[2,16,128], index: 0, kind: input, shape index: {}]   ;;  %s808_s1 = inlined_call_operand.vmem [shape: bf16[128,32], index: 1, kind: input, shape index: {}]   ;;  %s809_s2 = inlined_call_operand.vmem [shape: bf16[16,32], index: 2, kind: input, shape index: {}]   ;;  %s810_s3 = inlined_call_operand.hbm [shape: bf16[2,16,32], index: 3, kind: output, shape index: {}]  }
   0x1   :  { %10 = vsyncpa [#allocation3 + $0x1], 0  ;;  %s665_s12 = smov 0   ;;  %s667_s13 = smov 0  }
   0x2   :  { %s669_s14 = smov 0   ;;  %s671_s15 = smov 0  }
   0x3   :  { %s673_s16 = smov 0   ;;  %s675_s17 = smov 0  }
   0x4 LB: > { %s431_s18 = sadd.s32 4294967295, %s638_s17   ;;  %s432_s19 = sadd.s32 4294967294, %s638_s17   ;;  %s638_s17 = sphi %s675_s17, %s16_s17   ;;  %s634_s16 = sphi %s673_s16, %s817_s16   ;;  %s630_s15 = sphi %s671_s15, %s816_s15   ;;  %s626_s14 = sphi %s669_s14, %s815_s14   ;;  %s622_s13 = sphi %s667_s13, %s814_s13   ;;  %s618_s12 = sphi %s665_s12, %s813_s12  }
   0x5   : > { %s28_s20 = sadd.s32 1, %s634_s16  ;;  %s107_s21 = sadd.s32 1, %s626_s14 }
   0x6   : > { %p30_p0 = scmp.ge.s32.totalorder %s28_s20, 2  ;;  %p117_p1 = scmp.ne.s32.totalorder %s626_s14, %s622_s13 }
   0x7   : > { %p118_p2 = scmp.eq.s32.totalorder %s431_s18, 1  ;;  %p123_p3 = scmp.ne.s32.totalorder %s622_s13, %s618_s12 }
   0x8   : > { %s819_s20 = smov (%p30_p0, %s28_s20), 0  ;;  %p124_p5 = scmp.eq.s32.totalorder %s432_s19, 1 }
   0x9   : > { %p705_p4 = por %p118_p2, %p117_p1  ;;  %s102_s23 = ssub.s32 %s634_s16, %s819_s20 }
   0xa   : > { %p435_p6 = scmp.ge.s32.totalorder %s638_s17, 1  ;;  %p105_p7 = scmp.eq.s32.totalorder %s102_s23, 0 }
   0xb   : > { %p712_p8 = por %p124_p5, %p123_p3  ;;  %p161_p9 = scmp.lt.s32.totalorder %s638_s17, 3 }
   0xc   : > { %s718_s25 = scalar_select %p105_p7, %s626_s14, %s107_s21  }
   0xd   : > { %p162_p10 = pnand %p435_p6, %p161_p9 }
   0xe   : > { %v551_v0 = vld [vmem:[%s808_s1] sm:$0xff] (!%p162_p10)   ;;  %v640_v1 = vmov (!%p162_p10), 0.0   ;;  %v552_v2 = vld [vmem:[%s808_s1 + $0x8] sm:$0xff] (!%p162_p10)   ;;  %vm641_vm0 = vmmov (!%p162_p10), 0   ;;  %p190_p11 = scmp.lt.s32.totalorder (!%p162_p10), %s630_s15, 1  ;;  %v553_v3 = vld [vmem:[%s808_s1 + $0x10] sm:$0xff] (!%p162_p10)  }
   0xf   : > { %165 = sbr.rel (%p162_p10) target bundleno = 280 (0x118), region = 32  ;;  %472 = vmatprep.subr.bf16.mxu0 (!%p162_p10), %v640_v1  ;;  %488 = vmatprep.mubr.msk.bf16.mxu0 (!%p162_p10), %vm641_vm0, %v640_v1  ;;  %v554_v4 = vld [vmem:[%s808_s1 + $0x18] sm:$0xff] (!%p162_p10)   ;;  %v555_v5 = vld [vmem:[%s808_s1 + $0x20] sm:$0xff] (!%p162_p10)   ;;  %v556_v6 = vld [vmem:[%s808_s1 + $0x28] sm:$0xff] (!%p162_p10)   ;;  %s458_s10 = sshll.u32 (!%p162_p10), %s630_s15, 7  ;;  %vm331_vm1 = vcmask (!%p162_p10), 257024  }
  0x10   : > { %473 = vmatpush3.bf16.msra.mxu0 (!%p162_p10), %v551_v0  ;;  %v557_v7 = vld [vmem:[%s808_s1 + $0x30] sm:$0xff] (!%p162_p10)   ;;  %v558_v8 = vld [vmem:[%s808_s1 + $0x38] sm:$0xff] (!%p162_p10)   ;;  %v460_v10 = vld [vmem:[%s809_s2] sm:$0xff] (!%p162_p10)   ;;  %s759_s18 = scalar_lea.hbm (!%p162_p10), %s810_s3, %s458_s10  ;;  %s642_s21 = smov (!%p162_p10), [#allocation2]  }
  0x11   : > { %474 = vmatprep.subr.bf16.mxu0 (!%p162_p10), %v640_v1  ;;  %v461_v11 = vunpack.c.l.bf16 (!%p162_p10), %v460_v10  ;;  %v462_v12 = vunpack.c.h.bf16 (!%p162_p10), %v460_v10  ;;  %s564_s23 = sshll.u32 (!%p162_p10), %s642_s21, 4  ;;  %s565_s23 = int_to_ptr.vmem [resolvable:$false] %s564_s23 }
  0x12   : > { %s566_s26 = scalar_lea.vmem (!%p162_p10), %s565_s23, 256 }
  0x14   : > { %475 = vmatpush3.bf16.msra.mxu0 (!%p162_p10), %v552_v2 }
  0x15   : > { %476 = vmatprep.subr.bf16.mxu0 (!%p162_p10), %v640_v1 }
  0x16   : > { %s191_s30 = scalar_select %p190_p11, %s630_s15, 1 }
  0x18   : > { %s455_s6 = sshll.u32 %s191_s30, 3  ;;  %477 = vmatpush3.bf16.msra.mxu0 %v553_v3  ;;  %s186_s30 = sand.u32 1, %s622_s13  }
  0x19   : > { %s197_s9 = scalar_lea.vmem %s807_s0, %s455_s6  ;;  %478 = vmatprep.subr.bf16.mxu0 %v640_v1  ;;  %s436_s6 = sshll.u32 %s186_s30, 3 }
  0x1a   : > { %v559_v9 = vld [vmem:[%s197_s9] sm:$0xff]   ;;  %s188_s7 = scalar_lea.vmem [#allocation2], %s436_s6  ;;  %s761_s19 = scalar_lea.sflag [#allocation3], %s186_s30 }
  0x1b   : > { %s350_s8 = sshll.u32 %s188_s7, 4  ;;  %s754_s8 = int_to_ptr.vmem [resolvable:$true] %s350_s8 }
  0x1c   : > { %479 = vmatpush3.bf16.msra.mxu0 %v554_v4  ;;  %s560_s15 = scalar_lea.vmem %s754_s8, 128  ;;  %p567_p1 = scmp.lt.s32.totalorder %s754_s8, %s565_s23 }
  0x1d   : > { %480 = vmatprep.subr.bf16.mxu0 %v640_v1  ;;  %p561_p12 = scmp.ne.s32.totalorder %s754_s8, %s560_s15  ;;  %p568_p2 = scmp.lt.s32.totalorder %s566_s26, %s560_s15 }
  0x1f   : > { %p562_p13 = pnand %p561_p12, %p705_p4  ;;  %p569_p3 = por %p568_p2, %p567_p1 }
  0x20   : > { %481 = vmatpush3.bf16.msra.mxu0 %v555_v5 }
  0x21   : > { %482 = vmatprep.subr.bf16.mxu0 %v640_v1  ;;  %p563_p0 = pneg %p562_p13 }
  0x23   : > { %p570_p5 = pnand %p569_p3, %p563_p0 }
  0x24   : > { %483 = vmatpush3.bf16.msra.mxu0 %v556_v6 }
  0x25   : > { %484 = vmatprep.subr.bf16.mxu0 %v640_v1 }
  0x28   : > { %485 = vmatpush3.bf16.msra.mxu0 %v557_v7 }
  0x29   : > { %486 = vmatprep.subr.bf16.mxu0 %v640_v1 }
  0x2c   : > { %487 = vmatpush3.bf16.msra.mxu0 %v558_v8 }
  0x2f   : > { %489 = vmatmul.mubr.bf16.vlgmr.msra.gmra.mrb[0].mxu0 %v559_v9 }
 0x102   : > { %v316_v13 = vpop.f32.mrb[0].mxu0 }
 0x103   : > { %v317_v14 = vadd.f32 %v461_v11, %v316_v13  ;;  %v490_v15 = vpop.f32.mrb[1].mxu0 }
 0x104   : > { %v319_v16 = vpop.f32.mrb[2].mxu0 }
 0x105   : > { %v456_v17 = vpack.c.bf16 %v317_v14, %v317_v14  ;;  %v320_v18 = vadd.f32 %v462_v12, %v319_v16  ;;  %v491_v19 = vpop.f32.mrb[3].mxu0 }
 0x107   : > { %332 = vst.msk [vmem:[%s188_s7] sm:$0xf] %vm331_vm1, %v456_v17  ;;  %v457_v20 = vpack.c.bf16 %v320_v18, %v320_v18 }
 0x109   : > { %333 = vst.msk [vmem:[%s188_s7 + $0x4] sm:$0xf] %vm331_vm1, %v457_v20 }
 0x10a   : > { %573 = shalt.err (!%p570_p5)
}
 0x10b   : > { %s574_s27 = scalar_lea.hbm %s759_s18, 128  ;;  %s578_s30 = scalar_lea.hbm %s810_s3, 256 }
 0x10c   : > { %p575_p6 = scmp.ne.s32.totalorder %s759_s18, %s574_s27  ;;  %p579_p10 = scmp.lt.u32.totalorder %s759_s18, %s810_s3 }
 0x10d   : > { %p580_p11 = scmp.lt.u32.totalorder %s578_s30, %s574_s27  ;;  %p582_p13 = scmp.lt.u32.totalorder %s574_s27, %s759_s18 }
 0x10e   : > { %p576_p7 = pnand %p575_p6, %p705_p4 }
 0x10f   : > { %p581_p12 = por %p580_p11, %p579_p10 }
 0x110   : > { %p577_p9 = pneg %p576_p7 }
 0x111   : > { %p583_p0 = por %p582_p13, %p581_p12 }
 0x113   : > { %p584_p1 = pnand %p583_p0, %p577_p9 }
 0x115   : > { %587 = shalt.err (!%p584_p1)
}
 0x116   : > { %s643_s6 = smov 64   ;;  %s644_s7 = smov 4  }
 0x117   : > { %492 = dma.vmem_to_hbm [thread:$0]  (%p705_p4), %s754_s8, 128, %s759_s18, %s761_s19, %s643_s6, %s643_s6, %s644_s7  }
 0x118 PF: > { %p498_p2 = scmp.ge.s32.totalorder %s638_s17, 2  ;;  %s365_s10 = sand.u32 1, %s618_s12  }
 0x119   : > { %s366_s9 = scalar_lea.sflag [#allocation3], %s365_s10 }
 0x11a   : > { %p495_p3 = pnand %p498_p2, %p712_p8 }
 0x11c   : > { %613 = dma.done.wait (!%p495_p3), %s366_s9, 128  }
 0x11d   : > { %615 = vsyncadd (!%p495_p3), %s366_s9, 4294967168  ;;  %s16_s17 = sadd.s32 1, %s638_s17   ;;  %s813_s12 = smov %s622_s13 }
 0x11e   : > { %p13_p5 = scmp.ge.s32.totalorder %s16_s17, 4   ;;  %s814_s13 = smov %s626_s14 }
 0x11f   : > { %s815_s14 = smov %s718_s25  ;;  %s816_s15 = smov %s634_s16 }
 0x120   : > { %s817_s16 = smov %s819_s20  ;;  %15 = sbr.rel (!%p13_p5) target bundleno = 4 (0x4), region = 68 }
 0x127   :  { %371 = vsyncpa [#allocation3], 1 }
 0x128   :  { %373 = vsyncpa [#allocation3 + $0x1], 1 }

</bundles_post_ra>
